<compile_context>
chip_gen: v5e
topology: v5e:2x2
jax: 0.10.0
libtpu: 0.0.40
codegen_flags: <defaults>
</compile_context>

<pallas_src>
import jax
import jax.numpy as jnp
from jax.experimental import pallas as pl
from jax.experimental.pallas import tpu as pltpu

C_IN, C_OUT = 4, 5
COUT_PAD = 8                        # pad Cout 5 -> 8 sublanes: unmasked vregs/stores
KD = KH = KW = 2                    # Conv3d kernel (2, 2, 2), stride 1, no padding
POOL = 2                            # MaxPool3d (2, 2, 2), stride (2, 2, 2)
K_FLAT = C_IN * KD * KH * KW        # 32
N_PHASES = POOL * POOL * POOL       # 8


def fused_conv_pool_kernel(p_ref, w_ref, b_ref, o_ref):
    """One MXU matmul + phase-max + bias.

    p_ref: (32, 8*L)   im2col patches, phase-major blocks of L lanes
    w_ref: (8, 32)     conv weight, Cout zero-padded to 8
    b_ref: (8, 1)      conv bias, zero-padded
    o_ref: (8, L)      pooled output, L = N * Dp*Hp*Wp (lane-dense)
    """
    l = o_ref.shape[-1]
    conv = jnp.dot(w_ref[...], p_ref[...],
                   preferred_element_type=jnp.float32)        # (8, 8*L) on MXU
    # MaxPool = max over the 8 pooling-window phases: free 128-lane-aligned slices.
    pooled = conv[:, 0:l]
    for ph in range(1, N_PHASES):
        pooled = jnp.maximum(pooled, conv[:, ph * l:(ph + 1) * l])
    # Bias commutes with max (per-channel constant) -> add once at the end.
    o_ref[...] = (pooled + b_ref[...]).astype(o_ref.dtype)


def _phase_major_patches(x):
    """Cheap host-side layout glue (no MACs, ~12 XLA ops).

    x: (N, Cin, D, H, W) f32  ->  (32, 8 * N * Dp*Hp*Wp) with
    patches[cin*8 + kd*4 + kh*2 + kw,
            (a*4+b*2+c) * (N*M) + n*M + dp*Hp*Wp + hp*Wp + wp]
        = x[n, cin, 2*dp + a + kd, 2*hp + b + kh, 2*wp + c + kw]
    Trailing odd conv-output rows are dropped (PyTorch floor-mode pooling).
    """
    n, cin, d, h, w = x.shape
    dc, hc, wc = d - KD + 1, h - KH + 1, w - KW + 1          # conv output dims
    dp, hp, wp = dc // POOL, hc // POOL, wc // POOL          # pooled dims (floor)
    dc2, hc2, wc2 = dp * POOL, hp * POOL, wp * POOL          # crop to even
    # 8 contiguous (unstrided) tap slices; stacked axis ordered (kd, kh, kw) to match
    # the weight.reshape(Cout, Cin*8) row ordering.
    taps = jnp.stack(
        [x[:, :, kd:kd + dc2, kh:kh + hc2, kw:kw + wc2]
         for kd in range(KD) for kh in range(KH) for kw in range(KW)],
        axis=2)                                              # (N, Cin, 8, dc2, hc2, wc2)
    # Split each conv-output spatial dim into (pooled index, phase).
    taps = taps.reshape(n, cin, KD * KH * KW, dp, POOL, hp, POOL, wp, POOL)
    # -> (cin, tap, a, b, c, n, dp, hp, wp): rows = K, cols = phase-major (phase, n, m).
    patches = jnp.transpose(taps, (1, 2, 4, 6, 8, 0, 3, 5, 7))
    m = dp * hp * wp
    return patches.reshape(K_FLAT, N_PHASES * n * m), (dp, hp, wp)


def conv3d_maxpool(x, weight, bias):
    """model2.forward: Conv3d(4, 5, (2,2,2)) -> MaxPool3d((2,2,2), stride (2,2,2))."""
    n = x.shape[0]
    patches, (dp, hp, wp) = _phase_major_patches(x.astype(jnp.float32))
    m = dp * hp * wp
    l = n * m                                                # lane dim of the output

    w_pad = jnp.zeros((COUT_PAD, K_FLAT), jnp.float32).at[:C_OUT].set(
        weight.reshape(C_OUT, K_FLAT).astype(jnp.float32))
    b_pad = jnp.zeros((COUT_PAD, 1), jnp.float32).at[:C_OUT, 0].set(
        bias.astype(jnp.float32))

    out_flat = pl.pallas_call(
        fused_conv_pool_kernel,
        out_shape=jax.ShapeDtypeStruct((COUT_PAD, l), jnp.float32),
        grid=(1,),
        in_specs=[
            pl.BlockSpec((K_FLAT, N_PHASES * l), lambda i: (0, 0)),
            pl.BlockSpec((COUT_PAD, K_FLAT), lambda i: (0, 0)),
            pl.BlockSpec((COUT_PAD, 1), lambda i: (0, 0)),
        ],
        out_specs=pl.BlockSpec((COUT_PAD, l), lambda i: (0, 0)),
        compiler_params=pltpu.CompilerParams(dimension_semantics=("arbitrary",)),
    )(patches, w_pad, b_pad)

    out = out_flat[:C_OUT].reshape(C_OUT, n, dp, hp, wp)     # drop Cout padding
    return jnp.transpose(out, (1, 0, 2, 3, 4))               # NCDHW, matches PyTorch


def reference(x, weight, bias):
    """Plain-JAX reference (conv + floor-mode max pool), for correctness check."""
    conv = jax.lax.conv_general_dilated(
        x, weight, window_strides=(1, 1, 1), padding="VALID",
        dimension_numbers=("NCDHW", "OIDHW", "NCDHW"))
    conv = conv + bias.reshape(1, C_OUT, 1, 1, 1)
    n, co, d, h, w = conv.shape
    return conv.reshape(n, co, d // 2, 2, h // 2, 2, w // 2, 2).max(axis=(3, 5, 7))


if __name__ == "__main__":
    key = jax.random.PRNGKey(0)
    kx, kw_, kb = jax.random.split(key, 3)
    # Deterministic parameters (shapes implied by nn.Conv3d(4, 5, (2,2,2)))
    weight = 0.1 * jax.random.normal(kw_, (C_OUT, C_IN, KD, KH, KW), dtype=jnp.float32)
    bias = 0.1 * jax.random.normal(kb, (C_OUT,), dtype=jnp.float32)
    # Input NCDHW: spatial 9 -> conv out 8 -> pooled 4;  N*M = 2*64 = 128 lanes.
    x = jax.random.normal(kx, (2, C_IN, 9, 9, 9), dtype=jnp.float32)

    out = jax.jit(conv3d_maxpool)(x, weight, bias)
    out = jax.block_until_ready(out)

    ref = reference(x, weight, bias)
    assert out.shape == ref.shape == (2, C_OUT, 4, 4, 4), (out.shape, ref.shape)
    if not jnp.allclose(out, ref, atol=1e-2, rtol=1e-2):
        raise AssertionError(
            f"mismatch: max abs diff = {float(jnp.max(jnp.abs(out - ref)))}")
    print("KERNEL_OK")
</pallas_src>

<mosaic_0001>
module attributes {stable_mosaic.version = 11 : i64} {
  func.func @fused_conv_pool_kernel(%arg0: i32, %arg1: memref<32x1024xf32, #tpu.memory_space<vmem>>, %arg2: memref<8x32xf32, #tpu.memory_space<vmem>>, %arg3: memref<8x1xf32, #tpu.memory_space<vmem>>, %arg4: memref<8x128xf32, #tpu.memory_space<vmem>>) attributes {dimension_semantics = [#tpu.dimension_semantics<arbitrary>], iteration_bounds = array<i64: 1>, scalar_prefetch = 0 : i64, scratch_operands = 0 : i64, tpu.core_type = #tpu.core_type<tc>, window_params = [{pipeline_mode = #tpu.pipeline_mode<synchronous>, transform_indices = @transform_0, window_bounds = array<i64: 32, 1024>}, {pipeline_mode = #tpu.pipeline_mode<synchronous>, transform_indices = @transform_1, window_bounds = array<i64: 8, 32>}, {pipeline_mode = #tpu.pipeline_mode<synchronous>, transform_indices = @transform_2, window_bounds = array<i64: 8, 1>}, {pipeline_mode = #tpu.pipeline_mode<synchronous>, transform_indices = @transform_3, window_bounds = array<i64: 8, 128>}]} {
    %c0 = arith.constant 0 : index
    %c0_0 = arith.constant 0 : index
    %0 = vector.load %arg2[%c0, %c0_0] : memref<8x32xf32, #tpu.memory_space<vmem>>, vector<8x32xf32>
    %c0_1 = arith.constant 0 : index
    %c0_2 = arith.constant 0 : index
    %1 = vector.load %arg1[%c0_1, %c0_2] : memref<32x1024xf32, #tpu.memory_space<vmem>>, vector<32x1024xf32>
    %cst = arith.constant dense<0.000000e+00> : vector<8x1024xf32>
    %2 = tpu.matmul %0, %1, %cst {dimension_numbers = #tpu.dot_dimension_numbers<[1], [0], [0], [1], [0, 0, 1, 1], [], []>} : vector<8x32xf32>, vector<32x1024xf32>, vector<8x1024xf32> -> vector<8x1024xf32>
    %3 = vector.extract_strided_slice %2 {offsets = [0, 0], sizes = [8, 128], strides = [1, 1]} : vector<8x1024xf32> to vector<8x128xf32>
    %4 = vector.extract_strided_slice %2 {offsets = [0, 128], sizes = [8, 128], strides = [1, 1]} : vector<8x1024xf32> to vector<8x128xf32>
    %5 = arith.maximumf %3, %4 : vector<8x128xf32>
    %6 = vector.extract_strided_slice %2 {offsets = [0, 256], sizes = [8, 128], strides = [1, 1]} : vector<8x1024xf32> to vector<8x128xf32>
    %7 = arith.maximumf %5, %6 : vector<8x128xf32>
    %8 = vector.extract_strided_slice %2 {offsets = [0, 384], sizes = [8, 128], strides = [1, 1]} : vector<8x1024xf32> to vector<8x128xf32>
    %9 = arith.maximumf %7, %8 : vector<8x128xf32>
    %10 = vector.extract_strided_slice %2 {offsets = [0, 512], sizes = [8, 128], strides = [1, 1]} : vector<8x1024xf32> to vector<8x128xf32>
    %11 = arith.maximumf %9, %10 : vector<8x128xf32>
    %12 = vector.extract_strided_slice %2 {offsets = [0, 640], sizes = [8, 128], strides = [1, 1]} : vector<8x1024xf32> to vector<8x128xf32>
    %13 = arith.maximumf %11, %12 : vector<8x128xf32>
    %14 = vector.extract_strided_slice %2 {offsets = [0, 768], sizes = [8, 128], strides = [1, 1]} : vector<8x1024xf32> to vector<8x128xf32>
    %15 = arith.maximumf %13, %14 : vector<8x128xf32>
    %16 = vector.extract_strided_slice %2 {offsets = [0, 896], sizes = [8, 128], strides = [1, 1]} : vector<8x1024xf32> to vector<8x128xf32>
    %17 = arith.maximumf %15, %16 : vector<8x128xf32>
    %c0_3 = arith.constant 0 : index
    %c0_4 = arith.constant 0 : index
    %18 = vector.load %arg3[%c0_3, %c0_4] : memref<8x1xf32, #tpu.memory_space<vmem>>, vector<8x1xf32>
    %19 = vector.broadcast %18 : vector<8x1xf32> to vector<8x128xf32>
    %20 = arith.addf %17, %19 : vector<8x128xf32>
    %c0_5 = arith.constant 0 : index
    %c0_6 = arith.constant 0 : index
    %21 = vector.load %arg4[%c0_5, %c0_6] : memref<8x128xf32, #tpu.memory_space<vmem>>, vector<8x128xf32>
    tpu.vector_store %arg4[%c0_5, %c0_6], %20 {strides = array<i32>} : memref<8x128xf32, #tpu.memory_space<vmem>>, vector<8x128xf32>,
    return
  }
  func.func @transform_0(%arg0: i32) -> (i32, i32) {
    %c0_i32 = arith.constant 0 : i32
    %c0_i32_0 = arith.constant 0 : i32
    %c0_i32_1 = arith.constant 0 : i32
    return %c0_i32, %c0_i32_0 : i32, i32
  }
  func.func @transform_1(%arg0: i32) -> (i32, i32) {
    %c0_i32 = arith.constant 0 : i32
    %c0_i32_0 = arith.constant 0 : i32
    %c0_i32_1 = arith.constant 0 : i32
    return %c0_i32, %c0_i32_0 : i32, i32
  }
  func.func @transform_2(%arg0: i32) -> (i32, i32) {
    %c0_i32 = arith.constant 0 : i32
    %c0_i32_0 = arith.constant 0 : i32
    %c0_i32_1 = arith.constant 0 : i32
    return %c0_i32, %c0_i32_0 : i32, i32
  }
  func.func @transform_3(%arg0: i32) -> (i32, i32) {
    %c0_i32 = arith.constant 0 : i32
    %c0_i32_0 = arith.constant 0 : i32
    %c0_i32_1 = arith.constant 0 : i32
    return %c0_i32, %c0_i32_0 : i32, i32
  }
}

</mosaic_0001>

<bundles_post_ra>
// kernel: conv3d_maxpool.1
= control target key start
LH: loop header
LB: loop body
LE: loop exit
PB: predicated region body
PF: predicated region fallthrough
CT: control target
= control target key end

     0   :  { %v240_v3 = vmov 0   ;;  %vm47_vm0 = vcmask 261120   ;;  %s374_s0 = inlined_call_operand.vmem [shape: f32[32,1024], index: 0, kind: input, shape index: {}]   ;;  %s375_s1 = inlined_call_operand.vmem [shape: f32[8,32], index: 1, kind: input, shape index: {}]   ;;  %s376_s2 = inlined_call_operand.vmem [shape: f32[8,1], index: 2, kind: input, shape index: {}]   ;;  %s377_s3 = inlined_call_operand.vmem [shape: f32[8,128], index: 3, kind: output, shape index: {}]  }
   0x1   :  { %v41_v0 = vld [vmem:[%s374_s0 + $0xd0] sm:$0xff]  ;;  %v39_v1 = vld [vmem:[%s374_s0 + $0xc0] sm:$0xff]  ;;  %v40_v2 = vld [vmem:[%s374_s0 + $0xc8] sm:$0xff]  ;;  %239 = vset.pattern.permute.xlu0 %v240_v3 }
   0x2   :  { %103 = vmatpush.msra.mxu2 %v41_v0  ;;  %63 = vmatpush.msra.mxu0 %v39_v1  ;;  %v33_v4 = vld [vmem:[%s374_s0 + $0x90] sm:$0xff]  ;;  %v42_v5 = vld [vmem:[%s374_s0 + $0xd8] sm:$0xff]  ;;  %v31_v6 = vld [vmem:[%s374_s0 + $0x80] sm:$0xff] }
   0x3   :  { %83 = vmatpush.msra.mxu1 %v40_v2  ;;  %123 = vmatpush.msra.mxu3 %v42_v5  ;;  %v32_v7 = vld [vmem:[%s374_s0 + $0x88] sm:$0xff]  ;;  %v25_v8 = vld [vmem:[%s374_s0 + $0x50] sm:$0xff]  ;;  %v34_v9 = vld [vmem:[%s374_s0 + $0x98] sm:$0xff] }
   0x4   :  { %104 = vmatpush.msra.mxu2 %v33_v4  ;;  %64 = vmatpush.msra.mxu0 %v31_v6  ;;  %v23_v10 = vld [vmem:[%s374_s0 + $0x40] sm:$0xff]  ;;  %v24_v11 = vld [vmem:[%s374_s0 + $0x48] sm:$0xff]  ;;  %v17_v12 = vld [vmem:[%s374_s0 + $0x10] sm:$0xff] }
   0x5   :  { %84 = vmatpush.msra.mxu1 %v32_v7  ;;  %124 = vmatpush.msra.mxu3 %v34_v9  ;;  %v26_v13 = vld [vmem:[%s374_s0 + $0x58] sm:$0xff]  ;;  %v14_v14 = vld [vmem:[%s375_s1] sm:$0xff]  ;;  %v16_v16 = vld [vmem:[%s374_s0 + $0x8] sm:$0xff] }
   0x6   :  { %105 = vmatpush.msra.mxu2 %v25_v8  ;;  %65 = vmatpush.msra.mxu0 %v23_v10  ;;  %v15_v15 = vld [vmem:[%s374_s0] sm:$0xff]  ;;  %v45_v17 = vld [vmem:[%s374_s0 + $0xf0] sm:$0xff]  ;;  %v18_v18 = vld [vmem:[%s374_s0 + $0x18] sm:$0xff] }
   0x7   :  { %85 = vmatpush.msra.mxu1 %v24_v11  ;;  %125 = vmatpush.msra.mxu3 %v26_v13  ;;  %v43_v19 = vld [vmem:[%s374_s0 + $0xe0] sm:$0xff]  ;;  %v37_v20 = vld [vmem:[%s374_s0 + $0xb0] sm:$0xff]  ;;  %v46_v21 = vld [vmem:[%s374_s0 + $0xf8] sm:$0xff] }
   0x8   :  { %106 = vmatpush.msra.mxu2 %v17_v12  ;;  %66 = vmatpush.msra.mxu0 %v15_v15  ;;  %v35_v22 = vld [vmem:[%s374_s0 + $0xa0] sm:$0xff]  ;;  %v44_v23 = vld [vmem:[%s374_s0 + $0xe8] sm:$0xff]  ;;  %v29_v24 = vld [vmem:[%s374_s0 + $0x70] sm:$0xff] }
   0x9   :  { %232 = vmatmul.msk.f32.vlgmr.msra.gmra.mxu2 %vm47_vm0, %v14_v14  ;;  %86 = vmatpush.msra.mxu1 %v16_v16  ;;  %v38_v25 = vld [vmem:[%s374_s0 + $0xb8] sm:$0xff]  ;;  %v27_v26 = vld [vmem:[%s374_s0 + $0x60] sm:$0xff]  ;;  %v36_v27 = vld [vmem:[%s374_s0 + $0xa8] sm:$0xff] }
   0xa   :  { %183 = vmatpush.msrb.mxu2 %v45_v17  ;;  %126 = vmatpush.msra.mxu3 %v18_v18  ;;  %v21_v28 = vld [vmem:[%s374_s0 + $0x30] sm:$0xff]  ;;  %v30_v29 = vld [vmem:[%s374_s0 + $0x78] sm:$0xff]  ;;  %v19_v30 = vld [vmem:[%s374_s0 + $0x20] sm:$0xff] }
   0xb   :  { %230 = vmatmul.msk.f32.vlgmr.msra.gmra.mxu0 %vm47_vm0, %v14_v14  ;;  %231 = vmatmul.msk.f32.vlgmr.msra.gmra.mxu1 %vm47_vm0, %v14_v14  ;;  %v28_v31 = vld [vmem:[%s374_s0 + $0x68] sm:$0xff]  ;;  %v22_v32 = vld [vmem:[%s374_s0 + $0x38] sm:$0xff]  ;;  %v218_v34 = vld [vmem:[%s376_s2] sm:$0xff] }
   0xc   :  { %233 = vmatmul.msk.f32.vlgmr.msra.gmra.mxu3 %vm47_vm0, %v14_v14  ;;  %143 = vmatpush.msrb.mxu0 %v43_v19  ;;  %v20_v33 = vld [vmem:[%s374_s0 + $0x28] sm:$0xff] }
   0xd   :  { %184 = vmatpush.msrb.mxu2 %v37_v20  ;;  %203 = vmatpush.msrb.mxu3 %v46_v21 }
   0xe   :  { %144 = vmatpush.msrb.mxu0 %v35_v22  ;;  %163 = vmatpush.msrb.mxu1 %v44_v23 }
   0xf   :  { %185 = vmatpush.msrb.mxu2 %v29_v24  ;;  %204 = vmatpush.msrb.mxu3 %v38_v25 }
  0x10   :  { %145 = vmatpush.msrb.mxu0 %v27_v26  ;;  %164 = vmatpush.msrb.mxu1 %v36_v27 }
  0x11   :  { %186 = vmatpush.msrb.mxu2 %v21_v28  ;;  %205 = vmatpush.msrb.mxu3 %v30_v29 }
  0x12   :  { %146 = vmatpush.msrb.mxu0 %v19_v30  ;;  %165 = vmatpush.msrb.mxu1 %v28_v31 }
  0x13   :  { %236 = vmatmul.msk.f32.vlgmr.msrb.gmra.mxu2 %vm47_vm0, %v14_v14  ;;  %206 = vmatpush.msrb.mxu3 %v22_v32 }
  0x14   :  { %234 = vmatmul.msk.f32.vlgmr.msrb.gmra.mxu0 %vm47_vm0, %v14_v14  ;;  %166 = vmatpush.msrb.mxu1 %v20_v33 }
  0x15   :  { %237 = vmatmul.msk.f32.vlgmr.msrb.gmra.mxu3 %vm47_vm0, %v14_v14  ;;  %235 = vmatmul.msk.f32.vlgmr.msrb.gmra.mxu1 %vm47_vm0, %v14_v14 }
  0x16   :  { %221 = vperm.xlu0 %239, %v218_v34  }
  0x88   :  { %v68_v35 = vpop.f32.mrf.mxu0  ;;  %v88_v36 = vpop.f32.mrf.mxu1 }
  0x89   :  { %v211_v37 = vmax.f32 %v68_v35, %v88_v36  ;;  %v222_v49 = vpop.permute.xlu0 %221 }
  0x8c   :  { %v108_v38 = vpop.f32.mrf.mxu2 }
  0x8d   :  { %v212_v39 = vmax.f32 %v211_v37, %v108_v38 }
  0x8f   :  { %v128_v40 = vpop.f32.mrf.mxu3 }
  0x90   :  { %v213_v41 = vmax.f32 %v212_v39, %v128_v40 }
  0x91   :  { %v148_v42 = vpop.f32.mrf.mxu0 }
  0x92   :  { %v214_v43 = vmax.f32 %v213_v41, %v148_v42  ;;  %v168_v44 = vpop.f32.mrf.mxu1 }
  0x94   :  { %v215_v45 = vmax.f32 %v214_v43, %v168_v44 }
  0x96   :  { %v188_v46 = vpop.f32.mrf.mxu2 }
  0x97   :  { %v216_v47 = vmax.f32 %v215_v45, %v188_v46 }
  0x98   :  { %v208_v48 = vpop.f32.mrf.mxu3 }
  0x99   :  { %v217_v50 = vmax.f32 %v216_v47, %v208_v48 }
  0x9b   :  { %v224_v51 = vadd.f32 %v222_v49, %v217_v50 }
  0x9d   :  { %225 = vst [vmem:[%s377_s3] sm:$0xff] %v224_v51 }

</bundles_post_ra>
